<compile_context>
chip_gen: v7x
topology: tpu7x:2x2x1
jax: 0.10.0
libtpu: 0.0.40
codegen_flags: <defaults>
</compile_context>

<pallas_src>
import math

import jax
import jax.numpy as jnp
from jax.experimental import pallas as pl
from jax.experimental.pallas import tpu as pltpu

EVENT_SHAPE = (4, 16, 16)   # e.g. a 4-channel 16x16 image of independent quantized vars
NUM_BUCKETS = 8
LANES = 128
SUPER = 1024                # logits per kernel row: 8 lane-tiles of 128


def _iqd_log_prob_kernel(w_ref, lg_ref, sel_ref, out_ref):
    """One grid step processes `bt` full batch rows.

    w_ref:   (SUPER, n_ev)  bf16 constant 0/1 segment-sum matrix (resident in VMEM)
    lg_ref:  (bt*RS, SUPER) logits (bf16 or f32); RS super-rows per batch row
    sel_ref: (bt*RS, SUPER) int8 one-hot mask of the chosen bucket per event
    out_ref: (bt, 1, 128)   f32 per-row log_prob broadcast across lanes
    """
    rows, sup = lg_ref.shape
    bt = out_ref.shape[0]
    rs = rows // bt
    n_ev = w_ref.shape[1]                     # events per super-row (= sup // K)

    lg = lg_ref[...].astype(jnp.float32)      # (rows, sup)

    def _per_sample(v):                       # (bt, rs, X) -> (bt, 1, 1)
        return jnp.sum(jnp.sum(v, axis=2, keepdims=True), axis=1, keepdims=True)

    # ---- gather term: sum_e logits[e, bucket(x_e)] --------------------------
    sel = sel_ref[...].astype(jnp.float32)    # exact 0/1
    chosen_sum = _per_sample((lg * sel).reshape(bt, rs, sup))

    # ---- log-sum-exp term: sum_e log(sum_k exp(logits[e, k])) ---------------
    m = jnp.max(lg, axis=1, keepdims=True)    # per-super-row max, (rows, 1)
    p = jnp.exp(lg - m)                       # (rows, sup) f32
    # One bf16 MXU stream: per-event exp-sums land lane-dense, one event per lane.
    s = jnp.dot(p.astype(jnp.bfloat16), w_ref[...],
                preferred_element_type=jnp.float32)          # (rows, n_ev)
    log_s = jnp.log(s)                                        # dense EUP work
    lse_sum = (_per_sample(log_s.reshape(bt, rs, n_ev))
               + float(n_ev) * _per_sample(m.reshape(bt, rs, 1)))

    res = chosen_sum - lse_sum                                # (bt, 1, 1)
    out_ref[...] = jnp.broadcast_to(res, out_ref.shape)       # lane-dense, write-once


def _chosen_mask(x, E, K):
    """One-hot (over buckets) mask of the quantized value, flattened to match the
    module's native event-major / bucket-minor logits layout.  int8, exact 0/1."""
    B = x.shape[0]
    xb = x.reshape(B, E).astype(jnp.float32)
    bucket = jnp.clip(jnp.floor(xb * K), 0.0, float(K - 1)).astype(jnp.int32)
    sel = (bucket[..., None] == jnp.arange(K, dtype=jnp.int32)).astype(jnp.int8)
    return sel.reshape(B, E * K)


def _pick_block_rows(B, bt_max):
    """Block size: as large as VMEM allows (cap 128 for v7x's 64 MiB physical VMEM),
    but prefer >= 2 grid steps so both v7x TensorCores get work."""
    bt_max = max(1, min(int(bt_max), 128))
    if B >= 2 * bt_max:
        return bt_max
    if B >= 2:
        return pl.cdiv(B, 2)
    return 1


def independent_quantized_log_prob(logits, x, event_shape=EVENT_SHAPE,
                                   num_buckets=NUM_BUCKETS, block_rows=64):
    """logits: (B, prod(event_shape) * num_buckets), event-major / bucket-minor
               (exactly what the module's reshape implies).  Pass bfloat16 to halve
               the kernel's HBM traffic; any float dtype is upcast in-kernel.
       x:      (B, *event_shape) float in [0, 1)
       returns (B,) float32 = Independent(QuantizedDistribution(logits)).log_prob(x)
    """
    B = logits.shape[0]
    E = math.prod(event_shape)
    K = num_buckets
    assert logits.shape == (B, E * K)
    assert x.shape == (B,) + tuple(event_shape)
    assert SUPER % K == 0 and (E * K) % SUPER == 0
    RS = (E * K) // SUPER                   # super-rows per batch element
    assert RS % 8 == 0                      # keeps the in-kernel reshapes layout-trivial
    n_ev = SUPER // K                       # events per super-row (128 for K=8)

    bt = _pick_block_rows(B, block_rows)
    B_pad = pl.cdiv(B, bt) * bt

    lg_flat = logits                        # keep caller dtype (bf16 recommended)
    sel_flat = _chosen_mask(x, E, K)        # (B, E*K) int8
    if B_pad != B:
        pad = B_pad - B
        lg_flat = jnp.pad(lg_flat, ((0, pad), (0, 0)))
        sel_flat = jnp.pad(sel_flat, ((0, pad), (0, 0)))

    # Free, contiguous reshapes only — no HBM transpose.
    lg_v = lg_flat.reshape(B_pad * RS, SUPER)
    sel_v = sel_flat.reshape(B_pad * RS, SUPER)

    # Constant 0/1 segment-sum matrix: W[t, n] = 1 iff lane t belongs to event n.
    t = jnp.arange(SUPER, dtype=jnp.int32)
    w = (t[:, None] // K == jnp.arange(n_ev, dtype=jnp.int32)[None, :]
         ).astype(jnp.bfloat16)             # (SUPER, n_ev), resident in VMEM

    grid = (B_pad // bt,)
    out = pl.pallas_call(
        _iqd_log_prob_kernel,
        out_shape=jax.ShapeDtypeStruct((B_pad, 1, LANES), jnp.float32),
        grid_spec=pltpu.PrefetchScalarGridSpec(
            num_scalar_prefetch=0,
            grid=grid,
            in_specs=[
                pl.BlockSpec((SUPER, n_ev), lambda i: (0, 0)),       # constant/resident
                pl.BlockSpec((bt * RS, SUPER), lambda i: (i, 0)),
                pl.BlockSpec((bt * RS, SUPER), lambda i: (i, 0)),
            ],
            out_specs=pl.BlockSpec((bt, 1, LANES), lambda i: (i, 0, 0)),
        ),
        compiler_params=pltpu.CompilerParams(
            dimension_semantics=("parallel",),
            vmem_limit_bytes=64 * 1024 * 1024),
    )(w, lg_v, sel_v)
    return out[:B, 0, 0]


def _reference_log_prob(logits, x, event_shape=EVENT_SHAPE, num_buckets=NUM_BUCKETS):
    """Pure-JAX reference (mirrors Independent(QuantizedDistribution).log_prob)."""
    B = logits.shape[0]
    E = math.prod(event_shape)
    K = num_buckets
    lg = logits.astype(jnp.float32).reshape(B, E, K)
    logp = jax.nn.log_softmax(lg, axis=-1)                         # (B, E, K)
    bucket = jnp.clip(jnp.floor(x.astype(jnp.float32).reshape(B, E) * K),
                      0, K - 1).astype(jnp.int32)
    gathered = jnp.take_along_axis(logp, bucket[..., None], axis=-1)[..., 0]  # (B, E)
    return jnp.sum(gathered, axis=-1)                              # (B,)


if __name__ == "__main__":
    key = jax.random.PRNGKey(0)
    k1, k2 = jax.random.split(key)
    B = 2
    E = math.prod(EVENT_SHAPE)
    params_size = E * NUM_BUCKETS                 # == module.params_size() == 8192

    # bf16 logits (the HBM-halved path); the reference consumes the same bf16
    # values (upcast to f32), so the comparison is apples-to-apples.
    logits = jax.random.normal(k1, (B, params_size), dtype=jnp.float32
                               ).astype(jnp.bfloat16)
    x = jax.random.uniform(k2, (B,) + EVENT_SHAPE, dtype=jnp.float32)

    out = independent_quantized_log_prob(logits, x)
    jax.block_until_ready(out)

    ref = _reference_log_prob(logits, x)
    assert out.shape == (B,)
    assert jnp.allclose(out, ref, rtol=1e-4, atol=1e-4), (out, ref)
    print("KERNEL_OK")
</pallas_src>

<mosaic_0001>
module attributes {stable_mosaic.version = 11 : i64} {
  func.func @_iqd_log_prob_kernel(%arg0: i32, %arg1: memref<1024x128xbf16, #tpu.memory_space<vmem>>, %arg2: memref<8x1024xbf16, #tpu.memory_space<vmem>>, %arg3: memref<8x1024xi8, #tpu.memory_space<vmem>>, %arg4: memref<1x1x128xf32, #tpu.memory_space<vmem>>) attributes {dimension_semantics = [#tpu.dimension_semantics<parallel>], iteration_bounds = array<i64: 2>, scalar_prefetch = 0 : i64, scratch_operands = 0 : i64, tpu.core_type = #tpu.core_type<tc>, window_params = [{pipeline_mode = #tpu.pipeline_mode<synchronous>, transform_indices = @transform_0, window_bounds = array<i64: 1024, 128>}, {transform_indices = @transform_1, window_bounds = array<i64: 8, 1024>}, {transform_indices = @transform_2, window_bounds = array<i64: 8, 1024>}, {transform_indices = @transform_3, window_bounds = array<i64: 1, 1, 128>}]} {
    %c0 = arith.constant 0 : index
    %c0_0 = arith.constant 0 : index
    %0 = vector.load %arg2[%c0, %c0_0] : memref<8x1024xbf16, #tpu.memory_space<vmem>>, vector<8x1024xbf16>
    %1 = arith.extf %0 : vector<8x1024xbf16> to vector<8x1024xf32>
    %c0_1 = arith.constant 0 : index
    %c0_2 = arith.constant 0 : index
    %2 = vector.load %arg3[%c0_1, %c0_2] : memref<8x1024xi8, #tpu.memory_space<vmem>>, vector<8x1024xi8>
    %3 = arith.sitofp %2 : vector<8x1024xi8> to vector<8x1024xf32>
    %4 = arith.mulf %1, %3 : vector<8x1024xf32>
    %5 = vector.shape_cast %4 : vector<8x1024xf32> to vector<1x8x1024xf32>
    %cst = arith.constant dense<0.000000e+00> : vector<1x8xf32>
    %6 = vector.multi_reduction <add>, %5, %cst [2] : vector<1x8x1024xf32> to vector<1x8xf32>
    %7 = vector.shape_cast %6 : vector<1x8xf32> to vector<1x8x1xf32>
    %cst_3 = arith.constant dense<0.000000e+00> : vector<1x1xf32>
    %8 = vector.multi_reduction <add>, %7, %cst_3 [1] : vector<1x8x1xf32> to vector<1x1xf32>
    %9 = vector.shape_cast %8 : vector<1x1xf32> to vector<1x1x1xf32>
    %cst_4 = arith.constant dense<0xFF800000> : vector<8xf32>
    %10 = vector.multi_reduction <maximumf>, %1, %cst_4 [1] : vector<8x1024xf32> to vector<8xf32>
    %11 = vector.shape_cast %10 : vector<8xf32> to vector<8x1xf32>
    %12 = vector.broadcast %11 : vector<8x1xf32> to vector<8x1024xf32>
    %13 = arith.subf %1, %12 : vector<8x1024xf32>
    %14 = math.exp %13 : vector<8x1024xf32>
    %15 = arith.truncf %14 : vector<8x1024xf32> to vector<8x1024xbf16>
    %c0_5 = arith.constant 0 : index
    %c0_6 = arith.constant 0 : index
    %16 = vector.load %arg1[%c0_5, %c0_6] : memref<1024x128xbf16, #tpu.memory_space<vmem>>, vector<1024x128xbf16>
    %cst_7 = arith.constant dense<0.000000e+00> : vector<8x128xf32>
    %17 = tpu.matmul %15, %16, %cst_7 {dimension_numbers = #tpu.dot_dimension_numbers<[1], [0], [0], [1], [0, 0, 1, 1], [], []>} : vector<8x1024xbf16>, vector<1024x128xbf16>, vector<8x128xf32> -> vector<8x128xf32>
    %18 = math.log %17 : vector<8x128xf32>
    %19 = vector.shape_cast %18 : vector<8x128xf32> to vector<1x8x128xf32>
    %cst_8 = arith.constant dense<0.000000e+00> : vector<1x8xf32>
    %20 = vector.multi_reduction <add>, %19, %cst_8 [2] : vector<1x8x128xf32> to vector<1x8xf32>
    %21 = vector.shape_cast %20 : vector<1x8xf32> to vector<1x8x1xf32>
    %cst_9 = arith.constant dense<0.000000e+00> : vector<1x1xf32>
    %22 = vector.multi_reduction <add>, %21, %cst_9 [1] : vector<1x8x1xf32> to vector<1x1xf32>
    %23 = vector.shape_cast %22 : vector<1x1xf32> to vector<1x1x1xf32>
    %24 = vector.shape_cast %11 : vector<8x1xf32> to vector<1x8x1xf32>
    %cst_10 = arith.constant dense<0.000000e+00> : vector<1x8xf32>
    %25 = vector.multi_reduction <add>, %24, %cst_10 [2] : vector<1x8x1xf32> to vector<1x8xf32>
    %26 = vector.shape_cast %25 : vector<1x8xf32> to vector<1x8x1xf32>
    %cst_11 = arith.constant dense<0.000000e+00> : vector<1x1xf32>
    %27 = vector.multi_reduction <add>, %26, %cst_11 [1] : vector<1x8x1xf32> to vector<1x1xf32>
    %28 = vector.shape_cast %27 : vector<1x1xf32> to vector<1x1x1xf32>
    %cst_12 = arith.constant 1.280000e+02 : f32
    %29 = vector.broadcast %cst_12 : f32 to vector<1x1x1xf32>
    %30 = arith.mulf %29, %28 : vector<1x1x1xf32>
    %31 = arith.addf %23, %30 : vector<1x1x1xf32>
    %32 = arith.subf %9, %31 : vector<1x1x1xf32>
    %33 = vector.shape_cast %32 : vector<1x1x1xf32> to vector<1x1x1xf32>
    %34 = vector.broadcast %33 : vector<1x1x1xf32> to vector<1x1x128xf32>
    %c0_13 = arith.constant 0 : index
    %c0_14 = arith.constant 0 : index
    %c0_15 = arith.constant 0 : index
    %35 = vector.load %arg4[%c0_13, %c0_14, %c0_15] : memref<1x1x128xf32, #tpu.memory_space<vmem>>, vector<1x1x128xf32>
    tpu.vector_store %arg4[%c0_13, %c0_14, %c0_15], %34 {strides = array<i32>} : memref<1x1x128xf32, #tpu.memory_space<vmem>>, vector<1x1x128xf32>,
    return
  }
  func.func @transform_0(%arg0: i32) -> (i32, i32) {
    %c0_i32 = arith.constant 0 : i32
    %c0_i32_0 = arith.constant 0 : i32
    %c0_i32_1 = arith.constant 0 : i32
    return %c0_i32, %c0_i32_0 : i32, i32
  }
  func.func @transform_1(%arg0: i32) -> (i32, i32) {
    %c0_i32 = arith.constant 0 : i32
    %c0_i32_0 = arith.constant 0 : i32
    return %arg0, %c0_i32 : i32, i32
  }
  func.func @transform_2(%arg0: i32) -> (i32, i32) {
    %c0_i32 = arith.constant 0 : i32
    %c0_i32_0 = arith.constant 0 : i32
    return %arg0, %c0_i32 : i32, i32
  }
  func.func @transform_3(%arg0: i32) -> (i32, i32, i32) {
    %c0_i32 = arith.constant 0 : i32
    %c0_i32_0 = arith.constant 0 : i32
    %c0_i32_1 = arith.constant 0 : i32
    return %arg0, %c0_i32, %c0_i32_0 : i32, i32, i32
  }
}

</mosaic_0001>

<bundles_post_ra>
// kernel: tpu_custom_call.1
= control target key start
LH: loop header
LB: loop body
LE: loop exit
PB: predicated region body
PF: predicated region fallthrough
CT: control target
= control target key end

     0   :  { %8 = vsyncpa [#allocation3], 0  ;;  %s1931_s0 = inlined_call_operand.hbm [shape: bf16[1024,128], index: 0, kind: input, shape index: {}]   ;;  %s1932_s1 = inlined_call_operand.hbm [shape: bf16[16,1024], index: 1, kind: input, shape index: {}]   ;;  %s1933_s2 = inlined_call_operand.hbm [shape: s8[16,1024], index: 2, kind: input, shape index: {}]   ;;  %s1934_s3 = inlined_call_operand.hbm [shape: f32[2,1,128], index: 3, kind: output, shape index: {}]  }
   0x1   :  { %9 = vsyncpa [#allocation6], 0 }
   0x2   :  { %11 = vsyncpa [#allocation6 + $0x1], 0 }
   0x3   :  { %12 = vsyncpa [#allocation4], 0 }
   0x4   :  { %14 = vsyncpa [#allocation4 + $0x1], 0  ;;  %s1638_s12 = smov 0   ;;  %s1640_s13 = smov 0  }
   0x5   :  { %s1642_s14 = smov 0   ;;  %s1644_s15 = smov 0  }
   0x6 LB: > { %s1659_s16 = sadd.s32 1, %s1610_s15   ;;  %s48_s17 = sadd.s32 1, %s1606_s14  ;;  %s1610_s15 = sphi %s1644_s15, %s1961_s15   ;;  %s1606_s14 = sphi %s1642_s14, %s1960_s14   ;;  %s1602_s13 = sphi %s1640_s13, %s1959_s13   ;;  %s1598_s12 = sphi %s1638_s12, %s1958_s12  }
   0x7   : > { %s45_s18 = ssub.s32 %s1610_s15, %s1659_s16  ;;  %p55_p0 = scmp.ne.s32.totalorder %s1606_s14, %s1602_s13 }
   0x8   : > { %p46_p1 = scmp.eq.s32.totalorder %s45_s18, 0  ;;  %p56_p2 = scmp.eq.s32.totalorder %s1610_s15, 0 }
   0x9   : > { %p1332_p4 = scmp.lt.s32.totalorder %s1610_s15, 2  ;;  %s150_s20 = sand.u32 1, %s1610_s15  }
   0xa   : > { %s1670_s19 = scalar_select %p46_p1, %s1606_s14, %s48_s17  }
   0xb   : > { %p57_p5 = por %p56_p2, %p55_p0  ;;  %s152_s21 = sand.u32 1, %s1606_s14  }
   0xc   : > { %s1139_s22 = sshll.u32 %s152_s21, 5  ;;  %s1216_s23 = sshll.u32 %s1610_s15, 9 }
   0xd   : > { %s1681_s26 = scalar_lea.hbm %s1932_s1, %s1216_s23  ;;  %s154_s27 = scalar_lea.vmem [#allocation5], %s1139_s22 }
   0xe   : > { %s162_s28 = sshll.u32 %s154_s27, 4  ;;  %p1683_p6 = pnand %p1332_p4, %p57_p5  ;;  %s1687_s28 = int_to_ptr.vmem [resolvable:$true] %s162_s28 }
   0xf   : > { %s1689_s30 = sshll.u32 %s152_s21, 4  ;;  %s1691_s4 = scalar_lea.sflag [#allocation6], %s150_s20 }
  0x10   : > { %s1942_s29 = scalar_select %p1683_p6, 1, 0 }
  0x11   : > { %s1452_s5 = scalar_lea.hbm %s1681_s26, 512  ;;  %p1936_p8 = pneg %p1683_p6 }
  0x12   : > { %p1453_p7 = scmp.ne.s32.totalorder %s1681_s26, %s1452_s5  ;;  %s1457_s8 = scalar_lea.hbm %s1932_s1, 1024 }
  0x13   : > { %p1458_p11 = scmp.lt.u32.totalorder %s1681_s26, %s1932_s1  ;;  %p1459_p12 = scmp.lt.u32.totalorder %s1457_s8, %s1452_s5 }
  0x14   : > { %p1455_p9 = pnand %p1936_p8, %p1453_p7  ;;  %p1461_p1 = scmp.lt.u32.totalorder %s1452_s5, %s1681_s26 }
  0x15   : > { %p1460_p13 = por %p1459_p12, %p1458_p11 }
  0x16   : > { %p1456_p10 = pneg %p1455_p9 }
  0x17   : > { %p1462_p2 = por %p1461_p1, %p1460_p13 }
  0x19   : > { %p1463_p4 = pnand %p1462_p2, %p1456_p10 }
  0x1b   : > { %1466 = shalt.err (!%p1463_p4)
}
  0x1c   : > { %s1467_s11 = scalar_lea.vmem %s1687_s28, 512  ;;  %s1612_s17 = smov [#allocation5]  }
  0x1d   : > { %p1468_p5 = scmp.ne.s32.totalorder %s1687_s28, %s1467_s11  ;;  %s1472_s18 = sshll.u32 %s1612_s17, 4  ;;  %s1473_s18 = int_to_ptr.vmem [resolvable:$false] %s1472_s18 }
  0x1e   : > { %s1474_s20 = scalar_lea.vmem %s1473_s18, 1024  ;;  %p1475_p3 = scmp.lt.s32.totalorder %s1687_s28, %s1473_s18 }
  0x1f   : > { %p1470_p7 = pnand %p1468_p5, %p1936_p8  ;;  %p1476_p11 = scmp.lt.s32.totalorder %s1474_s20, %s1467_s11 }
  0x21   : > { %p1471_p9 = pneg %p1470_p7  ;;  %p1477_p12 = por %p1476_p11, %p1475_p3 }
  0x23   : > { %p1478_p13 = pnand %p1477_p12, %p1471_p9 }
  0x25   : > { %1481 = shalt.err (!%p1478_p13)
}
  0x26   : > { %1323 = dma.hbm_to_vmem [thread:$0]  (!%p1683_p6), %s1681_s26, 512, %s1687_s28, %s1691_s4  }
  0x27   : > { %s1720_s21 = sadd.s32 4294967295, %s1610_s15   ;;  %s1135_s22 = sadd.s32 4294967294, %s1610_s15  }
  0x28   : > { %p61_p3 = scmp.ne.s32.totalorder %s1602_s13, %s1598_s12  ;;  %p1935_p10 = scmp.eq.s32.totalorder %s1720_s21, 0 }
  0x29   : > { %p111_p1 = scmp.eq.s32.totalorder %s1720_s21, 1  ;;  %p117_p2 = scmp.eq.s32.totalorder %s1135_s22, 1 }
  0x2a   : > { %p1136_p4 = scmp.ge.s32.totalorder %s1610_s15, 1  ;;  %p1730_p5 = por %p1935_p10, %p61_p3 }
  0x2b   : > { %p1737_p7 = por %p111_p1, %p55_p0  ;;  %p1741_p9 = por %p117_p2, %p61_p3 }
  0x2c   : > { %s1943_s23 = scalar_select %p1730_p5, 1, 0 }
  0x2d   : > { %s1944_s24 = scalar_select %p1737_p7, 1, 0 }
  0x2e   : > { %s1945_s25 = scalar_select %p1741_p9, 1, 0 }
  0x2f   : > { %p124_p11 = scmp.lt.s32.totalorder %s1610_s15, 3  ;;  %s1613_s27 = smov [#allocation2]  }
  0x30   : > { %s136_s28 = sshll.u32 %s1613_s27, 4  ;;  %s1217_s5 = sshll.u32 %s1610_s15, 8  ;;  %s1750_s28 = int_to_ptr.vmem [resolvable:$true] %s136_s28 }
  0x31   : > { %p1746_p12 = pnand %p1136_p4, %p124_p11  ;;  %s1764_s9 = scalar_lea.hbm %s1933_s2, %s1217_s5 }
  0x32   : > { %s173_s10 = scalar_lea.vmem [#allocation7], %s1689_s30  ;;  %s1482_s20 = scalar_lea.hbm %s1931_s0, 8192 }
  0x33   : > { %s1946_s26 = scalar_select %p1746_p12, 1, 0 }
  0x34   : > { %p1316_p13 = pneg %p1746_p12  ;;  %s181_s11 = sshll.u32 %s173_s10, 4  ;;  %s1767_s11 = int_to_ptr.vmem [resolvable:$true] %s181_s11 }
  0x35   : > { %p1483_p3 = scmp.ne.s32.totalorder %s1931_s0, %s1482_s20  ;;  %p1489_p11 = scmp.lt.u32.totalorder %s1482_s20, %s1931_s0 }
  0x36   : > { %p1757_p0 = pnand %p1316_p13, %p1935_p10 }
  0x38   : > { %p1484_p1 = pneg %p1757_p0 }
  0x3a   : > { %p1485_p2 = pnand %p1484_p1, %p1483_p3 }
  0x3c   : > { %p1486_p4 = pneg %p1485_p2 }
  0x3e   : > { %p1491_p13 = pnand %p1489_p11, %p1486_p4 }
  0x40   : > { %1494 = shalt.err (!%p1491_p13)
}
  0x41   : > { %s1495_s30 = scalar_lea.vmem %s1750_s28, 8192  ;;  %p1503_p7 = scmp.lt.s32.totalorder %s1750_s28, %s1750_s28 }
  0x42   : > { %p1496_p10 = scmp.ne.s32.totalorder %s1750_s28, %s1495_s30  ;;  %p1504_p5 = scmp.lt.s32.totalorder %s1495_s30, %s1495_s30 }
  0x44   : > { %p1498_p8 = pnand %p1496_p10, %p1484_p1  ;;  %p1505_p12 = por %p1504_p5, %p1503_p7 }
  0x46   : > { %p1499_p9 = pneg %p1498_p8 }
  0x48   : > { %p1506_p6 = pnand %p1505_p12, %p1499_p9 }
  0x4a   : > { %1509 = shalt.err (!%p1506_p6)
}
  0x4b   : > { %s1614_s5 = smov 64   ;;  %s1615_s10 = smov 4  }
  0x4c   : > { %1319 = dma.hbm_to_vmem [thread:$0]  (!%p1757_p0), %s1931_s0, 8192, %s1750_s28, [#allocation3], %s1614_s5, %s1614_s5, %s1615_s10  }
  0x4d   : > { %s1510_s20 = scalar_lea.hbm %s1764_s9, 256  ;;  %p1948_p10 = scmp.ne.s32.totalorder %s1942_s29, 0 }
  0x4e   : > { %p1511_p8 = scmp.ne.s32.totalorder %s1764_s9, %s1510_s20  ;;  %s1515_s7 = scalar_lea.hbm %s1933_s2, 512 }
  0x4f   : > { %p1949_p5 = pneg %p1948_p10  ;;  %p1516_p9 = scmp.lt.u32.totalorder %s1764_s9, %s1933_s2 }
  0x50   : > { %p1517_p12 = scmp.lt.u32.totalorder %s1515_s7, %s1510_s20  ;;  %p1519_p1 = scmp.lt.u32.totalorder %s1510_s20, %s1764_s9 }
  0x51   : > { %p1513_p7 = pnand %p1511_p8, %p1949_p5 }
  0x52   : > { %p1518_p3 = por %p1517_p12, %p1516_p9 }
  0x53   : > { %p1514_p6 = pneg %p1513_p7 }
  0x54   : > { %p1520_p2 = por %p1519_p1, %p1518_p3 }
  0x56   : > { %p1521_p4 = pnand %p1520_p2, %p1514_p6 }
  0x58   : > { %1524 = shalt.err (!%p1521_p4)
}
  0x59   : > { %s1525_s28 = scalar_lea.vmem %s1767_s11, 256  ;;  %p1950_p11 = pmov %p1949_p5 }
  0x5a   : > { %p1526_p0 = scmp.ne.s32.totalorder %s1767_s11, %s1525_s28  ;;  %s1616_s6 = smov [#allocation7]  }
  0x5b   : > { %s1530_s5 = sshll.u32 %s1616_s6, 4  ;;  %s1531_s5 = int_to_ptr.vmem [resolvable:$false] %s1530_s5 }
  0x5c   : > { %p1528_p13 = pnand %p1526_p0, %p1950_p11  ;;  %s1532_s10 = scalar_lea.vmem %s1531_s5, 512 }
  0x5d   : > { %p1533_p5 = scmp.lt.s32.totalorder %s1767_s11, %s1531_s5  ;;  %p1534_p7 = scmp.lt.s32.totalorder %s1532_s10, %s1525_s28 }
  0x5e   : > { %p1529_p8 = pneg %p1528_p13 }
  0x5f   : > { %p1535_p9 = por %p1534_p7, %p1533_p5 }
  0x61   : > { %p1536_p12 = pnand %p1535_p9, %p1529_p8 }
  0x63   : > { %1539 = shalt.err (!%p1536_p12)
}
  0x64   : > { %1326 = dma.hbm_to_vmem [thread:$0]  (!%p1948_p10), %s1764_s9, 256, %s1767_s11, %s1691_s4  }
  0x65   : > { %p1951_p6 = scmp.ne.s32.totalorder %s1946_s26, 0 }
  0x66   : > { %p1952_p3 = scmp.eq.s32.totalorder (!%p1951_p6), %s1720_s21, 0 }
  0x67   : > { %190 = sbr.rel (%p1951_p6) target bundleno = 723 (0x2d3), region = 32 }
  0x6e   : > { %1585 = dma.done.wait (%p1952_p3), [#allocation3], 8192   ;;  %p1953_p1 = pmov %p1952_p3 }
  0x6f   : > { %s196_s17 = sand.u32 1, %s1720_s21   ;;  %s1822_s18 = sand.u32 1, %s1602_s13  }
  0x70   : > { %1587 = vsyncadd (%p1953_p1), [#allocation3], 4294959104  ;;  %s1147_s29 = sshll.u32 %s1822_s18, 5  ;;  %s197_s20 = scalar_lea.sflag [#allocation6], %s196_s17 }
  0x71   : > { %s200_s22 = scalar_lea.vmem [#allocation5], %s1147_s29  ;;  %p1954_p10 = scmp.ne.s32.totalorder %s1943_s23, 0 }
  0x73   : > { %1589 = dma.done.wait (%p1954_p10), %s197_s20, 768  }
  0x74   : > { %1591 = vsyncadd (%p1954_p10), %s197_s20, 4294966528  ;;  %v237_v0 = vld [vmem:[%s200_s22] sm:$0xff]  ;;  %v238_v1 = vld [vmem:[%s200_s22 + $0x8] sm:$0xff]  ;;  %s1148_s4 = sshll.u32 %s1822_s18, 4  ;;  %s1213_s26 = sshll.u32 %s1720_s21, 4 }
  0x75   : > { %v239_v2 = vld [vmem:[%s200_s22 + $0x10] sm:$0xff]  ;;  %v240_v3 = vld [vmem:[%s200_s22 + $0x18] sm:$0xff]  ;;  %v1829_v4 = vunpack.c.l.bf16 %v237_v0  ;;  %v1831_v5 = vunpack.c.h.bf16 %v237_v0  ;;  %v1833_v6 = vunpack.c.l.bf16 %v238_v1  ;;  %v1835_v7 = vunpack.c.h.bf16 %v238_v1  ;;  %v1370_v12 = vld [vmem:[#allocation2 + $0x40] sm:$0xff]   ;;  %s209_s23 = scalar_lea.vmem [#allocation7], %s1148_s4  ;;  %s235_s9 = scalar_lea.vmem [#allocation8], %s1822_s18 }
  0x76   : > { %v1837_v8 = vunpack.c.l.bf16 %v239_v2  ;;  %v1839_v9 = vunpack.c.h.bf16 %v239_v2  ;;  %v1841_v10 = vunpack.c.l.bf16 %v240_v3  ;;  %v1843_v11 = vunpack.c.h.bf16 %v240_v3  ;;  %v1371_v13 = vld [vmem:[#allocation2 + $0xc0] sm:$0xff]   ;;  %1218 = vmatprep.subr.bf16.mxu0 %v1370_v12  ;;  %v1374_v22 = vld [vmem:[#allocation2 + $0x48] sm:$0xff]   ;;  %v1378_v27 = vld [vmem:[#allocation2 + $0x50] sm:$0xff]   ;;  %s1037_s11 = sshll.u32 %s235_s9, 4  ;;  %s1887_s8 = scalar_lea.hbm %s1934_s3, %s1213_s26  ;;  %s1889_s11 = int_to_ptr.vmem [resolvable:$true] %s1037_s11 }
  0x77   : > { %v1372_v18 = vld [vmem:[#allocation2] sm:$0xff]   ;;  %1240 = vmatprep.subr.bf16.mxu1 %v1371_v13  ;;  %v1375_v23 = vld [vmem:[#allocation2 + $0xc8] sm:$0xff]   ;;  %v1379_v28 = vld [vmem:[#allocation2 + $0xd0] sm:$0xff]   ;;  %s1025_s30 = scalar_lea.sflag [#allocation4], %s1822_s18  ;;  %s1540_s28 = scalar_lea.vmem %s1889_s11, 16 }
  0x78   : > { %v290_v14 = vmax.f32 %v1829_v4, %v1837_v8  ;;  %v291_v15 = vmax.f32 %v1831_v5, %v1839_v9  ;;  %v292_v16 = vmax.f32 %v1833_v6, %v1841_v10  ;;  %v293_v17 = vmax.f32 %v1835_v7, %v1843_v11  ;;  %v1373_v19 = vld [vmem:[#allocation2 + $0x80] sm:$0xff]   ;;  %1219 = vmatpush3.bf16.msra.mxu0 %v1372_v18  ;;  %v1376_v25 = vld [vmem:[#allocation2 + $0x8] sm:$0xff]   ;;  %v1380_v29 = vld [vmem:[#allocation2 + $0x10] sm:$0xff]   ;;  %p1541_p2 = scmp.ne.s32.totalorder %s1889_s11, %s1540_s28  ;;  %p1955_p4 = scmp.ne.s32.totalorder %s1944_s24, 0 }
  0x79   : > { %1241 = vmatpush3.bf16.msra.mxu1 %v1373_v19  ;;  %1220 = vmatprep.subr.bf16.mxu0 %v1374_v22  ;;  %v1377_v26 = vld [vmem:[#allocation2 + $0x88] sm:$0xff]   ;;  %v1381_v30 = vld [vmem:[#allocation2 + $0x90] sm:$0xff]   ;;  %v1382_v31 = vld [vmem:[#allocation2 + $0x58] sm:$0xff]   ;;  %s1617_s21 = smov [#allocation8]  }
  0x7a   : > { %v294_v20 = vmax.f32 %v290_v14, %v291_v15  ;;  %v295_v21 = vmax.f32 %v292_v16, %v293_v17  ;;  %1242 = vmatprep.subr.bf16.mxu1 %v1375_v23  ;;  %v1383_v32 = vld [vmem:[#allocation2 + $0xd8] sm:$0xff]   ;;  %v1386_v35 = vld [vmem:[#allocation2 + $0x60] sm:$0xff]   ;;  %v1390_v39 = vld [vmem:[#allocation2 + $0x68] sm:$0xff]   ;;  %p1542_p0 = pnand %p1541_p2, %p1955_p4  ;;  %s1544_s6 = sshll.u32 %s1617_s21, 4  ;;  %s1545_s6 = int_to_ptr.vmem [resolvable:$false] %s1544_s6 }
  0x7b   : > { %v1384_v33 = vld [vmem:[#allocation2 + $0x18] sm:$0xff]   ;;  %v1387_v36 = vld [vmem:[#allocation2 + $0xe0] sm:$0xff]   ;;  %v1391_v40 = vld [vmem:[#allocation2 + $0xe8] sm:$0xff]   ;;  %s1546_s5 = scalar_lea.vmem %s1545_s6, 32  ;;  %p1547_p13 = scmp.lt.s32.totalorder %s1889_s11, %s1545_s6 }
  0x7c   : > { %v296_v24 = vmax.f32 %v294_v20, %v295_v21  ;;  %1221 = vmatpush3.bf16.msra.mxu0 %v1376_v25  ;;  %v1385_v34 = vld [vmem:[#allocation2 + $0x98] sm:$0xff]   ;;  %v1388_v37 = vld [vmem:[#allocation2 + $0x20] sm:$0xff]   ;;  %v1392_v41 = vld [vmem:[#allocation2 + $0x28] sm:$0xff]   ;;  %p1543_p11 = pneg %p1542_p0  ;;  %p1548_p8 = scmp.lt.s32.totalorder %s1546_s5, %s1540_s28 }
  0x7d   : > { %1243 = vmatpush3.bf16.msra.mxu1 %v1377_v26  ;;  %1222 = vmatprep.subr.bf16.mxu0 %v1378_v27  ;;  %v1389_v38 = vld [vmem:[#allocation2 + $0xa0] sm:$0xff]   ;;  %v1393_v42 = vld [vmem:[#allocation2 + $0xa8] sm:$0xff]   ;;  %v1394_v43 = vld [vmem:[#allocation2 + $0x70] sm:$0xff]  }
  0x7e   : > { %297 = vmax.xlane.f32.xlu0 %v296_v24  ;;  %1244 = vmatprep.subr.bf16.mxu1 %v1379_v28  ;;  %v1395_v44 = vld [vmem:[#allocation2 + $0xf0] sm:$0xff]   ;;  %v1398_v47 = vld [vmem:[#allocation2 + $0x78] sm:$0xff]   ;;  %v1402_v51 = vld [vmem:[#allocation2 + $0x140] sm:$0xff]   ;;  %p1549_p5 = por %p1548_p8, %p1547_p13 }
  0x7f   : > { %v1396_v45 = vld [vmem:[#allocation2 + $0x30] sm:$0xff]   ;;  %v1399_v48 = vld [vmem:[#allocation2 + $0xf8] sm:$0xff]   ;;  %v1403_v52 = vld [vmem:[#allocation2 + $0x1c0] sm:$0xff]  }
  0x80   : > { %1223 = vmatpush3.bf16.msra.mxu0 %v1380_v29  ;;  %v1397_v46 = vld [vmem:[#allocation2 + $0xb0] sm:$0xff]   ;;  %v1400_v49 = vld [vmem:[#allocation2 + $0x38] sm:$0xff]   ;;  %v1404_v15 = vld [vmem:[#allocation2 + $0x100] sm:$0xff]   ;;  %p1550_p7 = pnand %p1549_p5, %p1543_p11 }
  0x81   : > { %1245 = vmatpush3.bf16.msra.mxu1 %v1381_v30  ;;  %1224 = vmatprep.subr.bf16.mxu0 %v1382_v31  ;;  %v1401_v50 = vld [vmem:[#allocation2 + $0xb8] sm:$0xff]   ;;  %v1405_v18 = vld [vmem:[#allocation2 + $0x180] sm:$0xff]   ;;  %v1406_v21 = vld [vmem:[#allocation2 + $0x148] sm:$0xff]  }
  0x82   : > { %1246 = vmatprep.subr.bf16.mxu1 %v1383_v32  ;;  %v1407_v24 = vld [vmem:[#allocation2 + $0x1c8] sm:$0xff]   ;;  %v1410_v28 = vld [vmem:[#allocation2 + $0x150] sm:$0xff]   ;;  %v1414_v32 = vld [vmem:[#allocation2 + $0x158] sm:$0xff]  }
  0x83   : > { %v1408_v26 = vld [vmem:[#allocation2 + $0x108] sm:$0xff]   ;;  %v1411_v29 = vld [vmem:[#allocation2 + $0x1d0] sm:$0xff]  }
  0x84   : > { %1225 = vmatpush3.bf16.msra.mxu0 %v1384_v33  ;;  %v1409_v27 = vld [vmem:[#allocation2 + $0x188] sm:$0xff]   ;;  %v1412_v30 = vld [vmem:[#allocation2 + $0x110] sm:$0xff]   ;;  %v1415_v33 = vld [vmem:[#allocation2 + $0x1d8] sm:$0xff]  }
  0x85   : > { %1247 = vmatpush3.bf16.msra.mxu1 %v1385_v34  ;;  %1226 = vmatprep.subr.bf16.mxu0 %v1386_v35  ;;  %v1413_v31 = vld [vmem:[#allocation2 + $0x190] sm:$0xff]   ;;  %v1416_v34 = vld [vmem:[#allocation2 + $0x118] sm:$0xff]  }
  0x86   : > { %1248 = vmatprep.subr.bf16.mxu1 %v1387_v36  ;;  %v1417_v36 = vld [vmem:[#allocation2 + $0x198] sm:$0xff]  }
  0x88   : > { %1227 = vmatpush3.bf16.msra.mxu0 %v1388_v37  ;;  %v1418_v37 = vld [vmem:[#allocation2 + $0x160] sm:$0xff]  }
  0x89   : > { %1249 = vmatpush3.bf16.msra.mxu1 %v1389_v38  ;;  %1228 = vmatprep.subr.bf16.mxu0 %v1390_v39  ;;  %v1419_v39 = vld [vmem:[#allocation2 + $0x1e0] sm:$0xff]  }
  0x8a   : > { %1250 = vmatprep.subr.bf16.mxu1 %v1391_v40  ;;  %v1420_v40 = vld [vmem:[#allocation2 + $0x120] sm:$0xff]  }
  0x8c   : > { %1229 = vmatpush3.bf16.msra.mxu0 %v1392_v41 }
  0x8d   : > { %1251 = vmatpush3.bf16.msra.mxu1 %v1393_v42  ;;  %1230 = vmatprep.subr.bf16.mxu0 %v1394_v43  ;;  %v1421_v42 = vld [vmem:[#allocation2 + $0x1a0] sm:$0xff]   ;;  %v1422_v43 = vld [vmem:[#allocation2 + $0x168] sm:$0xff]  }
  0x8e   : > { %1252 = vmatprep.subr.bf16.mxu1 %v1395_v44 }
  0x90   : > { %1231 = vmatpush3.bf16.msra.mxu0 %v1396_v45  ;;  %v1423_v45 = vld [vmem:[#allocation2 + $0x1e8] sm:$0xff]  }
  0x91   : > { %1253 = vmatpush3.bf16.msra.mxu1 %v1397_v46  ;;  %1232 = vmatprep.subr.bf16.mxu0 %v1398_v47  ;;  %v1424_v46 = vld [vmem:[#allocation2 + $0x128] sm:$0xff]  }
  0x92   : > { %1254 = vmatprep.subr.bf16.mxu1 %v1399_v48  ;;  %v1425_v47 = vld [vmem:[#allocation2 + $0x1a8] sm:$0xff]   ;;  %v1426_v48 = vld [vmem:[#allocation2 + $0x170] sm:$0xff]  }
  0x94   : > { %1233 = vmatpush3.bf16.msra.mxu0 %v1400_v49  ;;  %v1427_v49 = vld [vmem:[#allocation2 + $0x1f0] sm:$0xff]  }
  0x95   : > { %1255 = vmatpush3.bf16.msra.mxu1 %v1401_v50  ;;  %1262 = vmatprep.subr.bf16.mxu0 %v1402_v51  ;;  %v1428_v50 = vld [vmem:[#allocation2 + $0x130] sm:$0xff]  }
  0x96   : > { %1284 = vmatprep.subr.bf16.mxu1 %v1403_v52  ;;  %v1429_v51 = vld [vmem:[#allocation2 + $0x1b0] sm:$0xff]   ;;  %v1430_v52 = vld [vmem:[#allocation2 + $0x178] sm:$0xff]  }
 0x10b   : > { %v1853_v53 = vpop.xlane.xlu0 %297 }
 0x10c   : > { %v300_v54 = vsub.f32 %v1831_v5, %v1853_v53  ;;  %v302_v55 = vsub.f32 %v1835_v7, %v1853_v53  ;;  %v299_v56 = vsub.f32 %v1829_v4, %v1853_v53  ;;  %v301_v57 = vsub.f32 %v1833_v6, %v1853_v53 }
 0x10d   : > { %v304_v58 = vsub.f32 %v1839_v9, %v1853_v53  ;;  %v306_v59 = vsub.f32 %v1843_v11, %v1853_v53  ;;  %v303_v35 = vsub.f32 %v1837_v8, %v1853_v53  ;;  %v305_v38 = vsub.f32 %v1841_v10, %v1853_v53 }
 0x10e   : > { %v309_v60 = vmul.f32 1.442695, %v300_v54  ;;  %v313_v61 = vmul.f32 1.442695, %v302_v55  ;;  %v307_v62 = vmul.f32 1.442695, %v299_v56 }
 0x10f   : > { %v311_v63 = vmul.f32 1.442695, %v301_v57  ;;  %v317_v0 = vmul.f32 1.442695, %v304_v58  ;;  %v321_v1 = vmul.f32 1.442695, %v306_v59 }
 0x110   : > { %1434 = vpow2.f32 %v309_v60  ;;  %v315_v41 = vmul.f32 1.442695, %v303_v35  ;;  %v319_v44 = vmul.f32 1.442695, %v305_v38  ;;  %v1431_v54 = vld [vmem:[#allocation2 + $0x1f8] sm:$0xff]  }
 0x111   : > { %1436 = vpow2.f32 %v313_v61  ;;  %v1432_v55 = vld [vmem:[#allocation2 + $0x138] sm:$0xff]   ;;  %v249_v61 = vld [vmem:[%s209_s23] sm:$0xff] }
 0x112   : > { %1438 = vpow2.f32 %v307_v62  ;;  %v1433_v56 = vld [vmem:[#allocation2 + $0x1b8] sm:$0xff]   ;;  %v251_v62 = vunpack.c.0.s8 %v249_v61 }
 0x113   : > { %1440 = vpow2.f32 %v311_v63  ;;  %v252_v63 = vunpack.c.1.s8 %v249_v61 }
 0x114   : > { %1442 = vpow2.f32 %v317_v0  ;;  %v253_v0 = vunpack.c.2.s8 %v249_v61 }
 0x115   : > { %1444 = vpow2.f32 %v321_v1  ;;  %v259_v1 = vcvt.s32.f32 %v251_v62 }
 0x116   : > { %1446 = vpow2.f32 %v315_v41 }
 0x117   : > { %1448 = vpow2.f32 %v319_v44 }
 0x11a   : > { %v1435_v2 = vpop.eup %1434 }
 0x11b   : > { %v1437_v3 = vpop.eup %1436  ;;  %v324_v12 = vpack.c.bf16 %v1435_v2, %v1435_v2  ;;  %v260_v2 = vcvt.s32.f32 %v252_v63 }
 0x11c   : > { %v1439_v13 = vpop.eup %1438  ;;  %v326_v14 = vpack.c.bf16 %v1437_v3, %v1437_v3  ;;  %v254_v3 = vunpack.c.3.s8 %v249_v61 }
 0x11d   : > { %v1441_v16 = vpop.eup %1440  ;;  %875 = vmatprep.mubr.bf16.mxu0 %v324_v12  ;;  %v323_v17 = vpack.c.bf16 %v1439_v13, %v1439_v13  ;;  %v261_v12 = vcvt.s32.f32 %v253_v0  ;;  %v267_v13 = vmul.f32 %v259_v1, %v1829_v4 }
 0x11e   : > { %v1443_v19 = vpop.eup %1442  ;;  %915 = vmatprep.mubr.bf16.mxu1 %v326_v14  ;;  %v325_v20 = vpack.c.bf16 %v1441_v16, %v1441_v16  ;;  %v268_v14 = vmul.f32 %v260_v2, %v1831_v5 }
 0x11f   : > { %v1445_v22 = vpop.eup %1444  ;;  %876 = vmatmul.mubr.bf16.vlgmr.msra.gmra.mrb[0].mxu0 %v323_v17  ;;  %v328_v23 = vpack.c.bf16 %v1443_v19, %v1443_v19 }
 0x120   : > { %916 = vmatmul.mubr.bf16.vlgmr.msra.gmra.mrb[0].mxu1 %v325_v20  ;;  %1263 = vmatpush3.bf16.msra.mxu0 %v1404_v15  ;;  %v330_v25 = vpack.c.bf16 %v1445_v22, %v1445_v22  ;;  %v1447_v57 = vpop.eup %1446  ;;  %v250_v15 = vld [vmem:[%s209_s23 + $0x8] sm:$0xff]  ;;  %v262_v20 = vcvt.s32.f32 %v254_v3  ;;  %v275_v22 = vadd.f32 %v268_v14, %v267_v13 }
 0x121   : > { %1285 = vmatpush3.bf16.msra.mxu1 %v1405_v18  ;;  %955 = vmatprep.mubr.bf16.mxu0 %v328_v23  ;;  %v1449_v58 = vpop.eup %1448  ;;  %v327_v59 = vpack.c.bf16 %v1447_v57, %v1447_v57  ;;  %v255_v16 = vunpack.c.0.s8 %v250_v15  ;;  %v256_v17 = vunpack.c.1.s8 %v250_v15  ;;  %v257_v18 = vunpack.c.2.s8 %v250_v15 }
 0x122   : > { %995 = vmatprep.mubr.bf16.mxu1 %v330_v25  ;;  %1264 = vmatprep.subr.bf16.mxu0 %v1406_v21  ;;  %v329_v60 = vpack.c.bf16 %v1449_v58, %v1449_v58  ;;  %v258_v19 = vunpack.c.3.s8 %v250_v15  ;;  %v269_v21 = vmul.f32 %v261_v12, %v1833_v6 }
 0x123   : > { %1286 = vmatprep.subr.bf16.mxu1 %v1407_v24  ;;  %v263_v23 = vcvt.s32.f32 %v255_v16  ;;  %v264_v24 = vcvt.s32.f32 %v256_v17  ;;  %v265_v25 = vcvt.s32.f32 %v257_v18 }
 0x124   : > { %1265 = vmatpush3.bf16.msra.mxu0 %v1408_v26  ;;  %v270_v26 = vmul.f32 %v262_v20, %v1835_v7  ;;  %v266_v4 = vcvt.s32.f32 %v258_v19 }
 0x125   : > { %1287 = vmatpush3.bf16.msra.mxu1 %v1409_v27  ;;  %1266 = vmatprep.subr.bf16.mxu0 %v1410_v28  ;;  %v276_v27 = vadd.f32 %v275_v22, %v269_v21  ;;  %v271_v28 = vmul.f32 %v263_v23, %v1837_v8  ;;  %v272_v5 = vmul.f32 %v264_v24, %v1839_v9 }
 0x126   : > { %1288 = vmatprep.subr.bf16.mxu1 %v1411_v29 }
 0x127   : > { %v277_v29 = vadd.f32 %v276_v27, %v270_v26 }
 0x128   : > { %1267 = vmatpush3.bf16.msra.mxu0 %v1412_v30  ;;  %v273_v30 = vmul.f32 %v265_v25, %v1841_v10 }
 0x129   : > { %1289 = vmatpush3.bf16.msra.mxu1 %v1413_v31  ;;  %1268 = vmatprep.subr.bf16.mxu0 %v1414_v32  ;;  %v278_v31 = vadd.f32 %v277_v29, %v271_v28  ;;  %v274_v32 = vmul.f32 %v266_v4, %v1843_v11 }
 0x12a   : > { %1290 = vmatprep.subr.bf16.mxu1 %v1415_v33 }
 0x12b   : > { %v279_v33 = vadd.f32 %v278_v31, %v272_v5 }
 0x12c   : > { %1269 = vmatpush3.bf16.msra.mxu0 %v1416_v34 }
 0x12d   : > { %1291 = vmatpush3.bf16.msra.mxu1 %v1417_v36  ;;  %1270 = vmatprep.subr.bf16.mxu0 %v1418_v37  ;;  %v280_v6 = vadd.f32 %v279_v33, %v273_v30 }
 0x12e   : > { %1292 = vmatprep.subr.bf16.mxu1 %v1419_v39 }
 0x12f   : > { %v281_v34 = vadd.f32 %v280_v6, %v274_v32 }
 0x130   : > { %1271 = vmatpush3.bf16.msra.mxu0 %v1420_v40 }
 0x131   : > { %1293 = vmatpush3.bf16.msra.mxu1 %v1421_v42  ;;  %1272 = vmatprep.subr.bf16.mxu0 %v1422_v43 }
 0x132   : > { %1294 = vmatprep.subr.bf16.mxu1 %v1423_v45  ;;  %282 = vadd.xlane.f32.xlu1 %v281_v34 }
 0x134   : > { %1273 = vmatpush3.bf16.msra.mxu0 %v1424_v46 }
 0x135   : > { %1295 = vmatpush3.bf16.msra.mxu1 %v1425_v47  ;;  %1274 = vmatprep.subr.bf16.mxu0 %v1426_v48 }
 0x136   : > { %1296 = vmatprep.subr.bf16.mxu1 %v1427_v49 }
 0x138   : > { %1275 = vmatpush3.bf16.msra.mxu0 %v1428_v50 }
 0x139   : > { %1297 = vmatpush3.bf16.msra.mxu1 %v1429_v51  ;;  %1276 = vmatprep.subr.bf16.mxu0 %v1430_v52 }
 0x13a   : > { %1298 = vmatprep.subr.bf16.mxu1 %v1431_v54 }
 0x13c   : > { %1277 = vmatpush3.bf16.msra.mxu0 %v1432_v55 }
 0x13d   : > { %1299 = vmatpush3.bf16.msra.mxu1 %v1433_v56  ;;  %v1014_v56 = vrot.slane %v1853_v53, 4 }
 0x13f   : > { %956 = vmatmul.mubr.bf16.vlgmr.msra.gmra.mrb[4].mxu0 %v327_v59  ;;  %v1015_v58 = vadd.f32 %v1014_v56, %v1853_v53 }
 0x140   : > { %996 = vmatmul.mubr.bf16.vlgmr.msra.gmra.mrb[4].mxu1 %v329_v60 }
 0x141   : > { %v1016_v60 = vrot.slane %v1015_v58, 2 }
 0x143   : > { %v1017_v62 = vadd.f32 %v1016_v60, %v1015_v58 }
 0x145   : > { %v1018_v2 = vrot.slane %v1017_v62, 1 }
 0x147   : > { %v1019_v14 = vadd.f32 %v1018_v2, %v1017_v62 }
 0x149   : > { %v1020_v53 = vmul.f32 128.0, %v1019_v14 }
 0x1bf   : > { %v283_v57 = vpop.xlane.xlu1 %282 }
 0x1c0   : > { %v284_v59 = vrot.slane %v283_v57, 4 }
 0x1c2   : > { %v285_v61 = vadd.f32 %v284_v59, %v283_v57 }
 0x1c4   : > { %v286_v0 = vrot.slane %v285_v61, 2 }
 0x1c6   : > { %v287_v12 = vadd.f32 %v286_v0, %v285_v61 }
 0x1c8   : > { %v288_v16 = vrot.slane %v287_v12, 1 }
 0x1ca   : > { %v289_v19 = vadd.f32 %v288_v16, %v287_v12 }
 0x1f2   : > { %v1234_v35 = vpop.f32.mrb[0].mxu0 }
 0x1f3   : > { %v1256_v36 = vpop.f32.mrb[0].mxu1  ;;  %v1235_v37 = vpop.f32.mrb[1].mxu0 }
 0x1f4   : > { %v1236_v7 = vadd.f32 %v1235_v37, %v1234_v35  ;;  %v1257_v38 = vpop.f32.mrb[1].mxu1  ;;  %v1237_v39 = vpop.f32.mrb[2].mxu0 }
 0x1f5   : > { %v1258_v8 = vadd.f32 %v1257_v38, %v1256_v36  ;;  %v1259_v40 = vpop.f32.mrb[2].mxu1  ;;  %v1238_v41 = vpop.f32.mrb[3].mxu0 }
 0x1f6   : > { %v1260_v9 = vpop.f32.mrb[3].mxu1 }
 0x1f7   : > { %v918_v42 = vadd.f32 %v1258_v8, %v1236_v7 }
 0x212   : > { %v1278_v43 = vpop.f32.mrb[4].mxu0 }
 0x213   : > { %v1300_v10 = vpop.f32.mrb[4].mxu1  ;;  %v1279_v44 = vpop.f32.mrb[5].mxu0 }
 0x214   : > { %v1280_v45 = vadd.f32 %v1279_v44, %v1278_v43  ;;  %v1301_v11 = vpop.f32.mrb[5].mxu1  ;;  %v1281_v46 = vpop.f32.mrb[6].mxu0 }
 0x215   : > { %v1302_v47 = vadd.f32 %v1301_v11, %v1300_v10  ;;  %v1303_v48 = vpop.f32.mrb[6].mxu1  ;;  %v1282_v49 = vpop.f32.mrb[7].mxu0 }
 0x216   : > { %v958_v50 = vadd.f32 %v1280_v45, %v918_v42  ;;  %v1304_v51 = vpop.f32.mrb[7].mxu1 }
 0x218   : > { %v998_v52 = vadd.f32 %v1302_v47, %v958_v50 }
 0x21a   : > { %1450 = vlog2.f32 %v998_v52 }
 0x224   : > { %v1451_v54 = vpop.eup %1450 }
 0x225   : > { %v1004_v55 = vmul.f32 0.6931472, %v1451_v54 }
 0x227   : > { %1005 = vadd.xlane.f32.xlu0 %v1004_v55 }
 0x2b4   : > { %v1006_v63 = vpop.xlane.xlu0 %1005 }
 0x2b5   : > { %v1007_v1 = vrot.slane %v1006_v63, 4 }
 0x2b7   : > { %v1008_v3 = vadd.f32 %v1007_v1, %v1006_v63 }
 0x2b9   : > { %v1009_v13 = vrot.slane %v1008_v3, 2 }
 0x2bb   : > { %v1010_v15 = vadd.f32 %v1009_v13, %v1008_v3 }
 0x2bd   : > { %v1011_v17 = vrot.slane %v1010_v15, 1 }
 0x2bf   : > { %v1012_v18 = vadd.f32 %v1011_v17, %v1010_v15 }
 0x2c1   : > { %v1021_v20 = vadd.f32 %v1020_v53, %v1012_v18 }
 0x2c3   : > { %v1022_v21 = vsub.f32 %v289_v19, %v1021_v20 }
 0x2c5   : > { %1023 = vst [vmem:[%s235_s9] sm:$0x1] %v1022_v21 }
 0x2c6   : > { %1553 = shalt.err (!%p1550_p7)
}
 0x2c7   : > { %s1554_s10 = scalar_lea.hbm %s1887_s8, 16  ;;  %s1558_s29 = scalar_lea.hbm %s1934_s3, 32 }
 0x2c8   : > { %p1555_p9 = scmp.ne.s32.totalorder %s1887_s8, %s1554_s10  ;;  %p1559_p3 = scmp.lt.u32.totalorder %s1887_s8, %s1934_s3 }
 0x2c9   : > { %p1560_p1 = scmp.lt.u32.totalorder %s1558_s29, %s1554_s10  ;;  %p1562_p2 = scmp.lt.u32.totalorder %s1554_s10, %s1887_s8 }
 0x2ca   : > { %p1556_p12 = pnand %p1555_p9, %p1955_p4 }
 0x2cb   : > { %p1561_p10 = por %p1560_p1, %p1559_p3 }
 0x2cc   : > { %p1557_p6 = pneg %p1556_p12 }
 0x2cd   : > { %p1563_p0 = por %p1562_p2, %p1561_p10 }
 0x2cf   : > { %p1564_p11 = pnand %p1563_p0, %p1557_p6 }
 0x2d1   : > { %1567 = shalt.err (!%p1564_p11)
}
 0x2d2   : > { %1314 = dma.vmem_to_hbm [thread:$0]  (%p1955_p4), %s1889_s11, 16, %s1887_s8, %s1025_s30  }
 0x2d3 PF: > { %s1049_s4 = sand.u32 1, %s1598_s12   ;;  %p1956_p13 = scmp.ne.s32.totalorder %s1945_s25, 0 }
 0x2d4   : > { %p1957_p8 = scmp.ge.s32.totalorder %s1610_s15, 2  ;;  %s1050_s23 = scalar_lea.sflag [#allocation4], %s1049_s4 }
 0x2d6   : > { %p1328_p5 = pnand %p1957_p8, %p1956_p13 }
 0x2d8   : > { %1593 = dma.done.wait (!%p1328_p5), %s1050_s23, 16  }
 0x2d9   : > { %1595 = vsyncadd (!%p1328_p5), %s1050_s23, 4294967280  ;;  %p17_p7 = scmp.ge.s32.totalorder %s1659_s16, 4   ;;  %s1958_s12 = smov %s1602_s13 }
 0x2da   : > { %s1959_s13 = smov %s1606_s14  ;;  %s1960_s14 = smov %s1670_s19 }
 0x2db   : > { %s1961_s15 = smov %s1659_s16  ;;  %19 = sbr.rel (!%p17_p7) target bundleno = 6 (0x6), region = 93 }
 0x2e2   :  { %1054 = vsyncpa [#allocation3], 1 }
 0x2e3   :  { %1056 = vsyncpa [#allocation3 + $0x1], 1 }
 0x2e4   :  { %1057 = vsyncpa [#allocation6], 1 }
 0x2e5   :  { %1059 = vsyncpa [#allocation6 + $0x1], 1 }
 0x2e6   :  { %1060 = vsyncpa [#allocation4], 1 }
 0x2e7   :  { %1062 = vsyncpa [#allocation4 + $0x1], 1 }

</bundles_post_ra>
